<compile_context>
chip_gen: v7x
topology: tpu7x:2x2x1
jax: 0.10.0
libtpu: 0.0.40
codegen_flags: <defaults>
</compile_context>

<pallas_src>
import functools

import jax
import jax.numpy as jnp
from jax.experimental import pallas as pl
from jax.experimental.pallas import tpu as pltpu


def _dattn_gated_kernel(x_ref, wab_ref, bab_ref, wc_ref, bc_ref, out_ref):
    x = x_ref[...]

    # Fused attention_a / attention_b projection: (tile_n, 2D), f32 accumulate.
    h = (jnp.dot(x, wab_ref[...], preferred_element_type=jnp.float32)
         + bab_ref[...].astype(jnp.float32))

    D = wab_ref.shape[1] // 2
    a = jnp.tanh(h[:, :D])            # attention_a branch
    b = jax.nn.sigmoid(h[:, D:])      # attention_b branch
    gated = a * b                     # (tile_n, D), f32

    # attention_c, computed transposed -> (C, tile_n) so the output store is
    # lane-dense (full 128-lane vst) instead of C=1 masked single-lane stores.
    out_t = jax.lax.dot_general(
        wc_ref[...].astype(jnp.float32), gated,
        dimension_numbers=(((0,), (1,)), ((), ())),
        preferred_element_type=jnp.float32,
    ) + bc_ref[...].astype(jnp.float32)

    out_ref[...] = out_t.astype(out_ref.dtype)


@functools.partial(jax.jit, static_argnames=("tile_n",))
def dattn_net_gated(x, wa, ba, wb, bb, wc, bc, *, tile_n=256):
    """Returns (A, x) matching DAttn_Net_Gated.forward.

    x : (N, L)   wa, wb : (L, D)   ba, bb : (D,)   wc : (D, C)   bc : (C,)
    tile_n must be a multiple of 128 (out-block lane constraint).
    """
    N, L = x.shape
    D = wa.shape[1]
    C = wc.shape[1]
    assert tile_n % 128 == 0, "tile_n must be a multiple of 128"

    # Fuse the two hidden projections into one (L, 2D) weight / (1, 2D) bias.
    wab = jnp.concatenate([wa, wb], axis=1)                  # (L, 2D)
    bab = jnp.concatenate([ba, bb], axis=0).reshape(1, 2 * D)
    bc2 = bc.reshape(C, 1)                                   # column bias for (C, tile_n)

    # Pad N up to a multiple of tile_n (robust to arbitrary batch sizes).
    n_pad = pl.cdiv(N, tile_n) * tile_n
    x_p = jnp.pad(x, ((0, n_pad - N), (0, 0))) if n_pad != N else x

    grid = (n_pad // tile_n,)

    A_t = pl.pallas_call(
        _dattn_gated_kernel,
        out_shape=jax.ShapeDtypeStruct((C, n_pad), x.dtype),
        grid_spec=pltpu.PrefetchScalarGridSpec(
            num_scalar_prefetch=0,
            grid=grid,
            in_specs=[
                pl.BlockSpec((tile_n, L), lambda i: (i, 0)),   # x tile (streamed)
                pl.BlockSpec((L, 2 * D), lambda i: (0, 0)),    # Wa|Wb fused (resident)
                pl.BlockSpec((1, 2 * D), lambda i: (0, 0)),    # ba|bb fused
                pl.BlockSpec((D, C), lambda i: (0, 0)),        # Wc (resident)
                pl.BlockSpec((C, 1), lambda i: (0, 0)),        # bc
            ],
            out_specs=pl.BlockSpec((C, tile_n), lambda i: (0, i)),  # lane-dense out
        ),
        compiler_params=pltpu.CompilerParams(
            dimension_semantics=("parallel",)),
    )(x_p, wab, bab, wc, bc2)

    A = A_t.T[:N]        # (N, C): transpose back + drop padded rows
    return A, x


def _init_linear(key, fan_in, fan_out, dtype=jnp.float32):
    """Deterministic nn.Linear-style init, returns (W[in,out], b[out])."""
    kw, kb = jax.random.split(key)
    bound = 1.0 / jnp.sqrt(fan_in)
    w = jax.random.uniform(kw, (fan_in, fan_out), dtype, -bound, bound)
    b = jax.random.uniform(kb, (fan_out,), dtype, -bound, bound)
    return w, b


def _reference(x, wa, ba, wb, bb, wc, bc):
    a = jnp.tanh(x @ wa + ba)
    b = jax.nn.sigmoid(x @ wb + bb)
    A = (a * b) @ wc + bc
    return A, x


if __name__ == "__main__":
    # Small shapes consistent with the module (module defaults are L=1024,
    # D=256, n_classes=1): N=300 instances (non-multiple of tile to exercise
    # the padding path, and >=2 grid steps for v7x's two TensorCores),
    # L=128 features, D=64 hidden, C=1 class.
    N, L, D, C = 300, 128, 64, 1

    key = jax.random.PRNGKey(0)
    kx, ka, kb, kc = jax.random.split(key, 4)

    x = jax.random.normal(kx, (N, L), jnp.float32)
    wa, ba = _init_linear(ka, L, D)
    wb, bb = _init_linear(kb, L, D)
    wc, bc = _init_linear(kc, D, C)

    A, x_out = dattn_net_gated(x, wa, ba, wb, bb, wc, bc, tile_n=256)
    A = jax.block_until_ready(A)
    x_out = jax.block_until_ready(x_out)

    A_ref, _ = _reference(x, wa, ba, wb, bb, wc, bc)
    assert A.shape == (N, C)
    assert x_out.shape == (N, L)
    assert jnp.allclose(A, A_ref, atol=1e-5, rtol=1e-5), "mismatch vs reference"
    assert jnp.allclose(x_out, x), "x passthrough mismatch"

    print("KERNEL_OK")
</pallas_src>

<mosaic_0001>
module attributes {stable_mosaic.version = 11 : i64} {
  func.func @_dattn_gated_kernel(%arg0: i32, %arg1: memref<256x128xf32, #tpu.memory_space<vmem>>, %arg2: memref<128x128xf32, #tpu.memory_space<vmem>>, %arg3: memref<1x128xf32, #tpu.memory_space<vmem>>, %arg4: memref<64x1xf32, #tpu.memory_space<vmem>>, %arg5: memref<1x1xf32, #tpu.memory_space<vmem>>, %arg6: memref<1x256xf32, #tpu.memory_space<vmem>>) attributes {dimension_semantics = [#tpu.dimension_semantics<parallel>], iteration_bounds = array<i64: 2>, scalar_prefetch = 0 : i64, scratch_operands = 0 : i64, tpu.core_type = #tpu.core_type<tc>, window_params = [{transform_indices = @transform_0, window_bounds = array<i64: 256, 128>}, {pipeline_mode = #tpu.pipeline_mode<synchronous>, transform_indices = @transform_1, window_bounds = array<i64: 128, 128>}, {pipeline_mode = #tpu.pipeline_mode<synchronous>, transform_indices = @transform_2, window_bounds = array<i64: 1, 128>}, {pipeline_mode = #tpu.pipeline_mode<synchronous>, transform_indices = @transform_3, window_bounds = array<i64: 64, 1>}, {pipeline_mode = #tpu.pipeline_mode<synchronous>, transform_indices = @transform_4, window_bounds = array<i64: 1, 1>}, {transform_indices = @transform_5, window_bounds = array<i64: 1, 256>}]} {
    %c0 = arith.constant 0 : index
    %c0_0 = arith.constant 0 : index
    %0 = vector.load %arg1[%c0, %c0_0] : memref<256x128xf32, #tpu.memory_space<vmem>>, vector<256x128xf32>
    %c0_1 = arith.constant 0 : index
    %c0_2 = arith.constant 0 : index
    %1 = vector.load %arg2[%c0_1, %c0_2] : memref<128x128xf32, #tpu.memory_space<vmem>>, vector<128x128xf32>
    %cst = arith.constant dense<0.000000e+00> : vector<256x128xf32>
    %2 = tpu.matmul %0, %1, %cst {dimension_numbers = #tpu.dot_dimension_numbers<[1], [0], [0], [1], [0, 0, 1, 1], [], []>} : vector<256x128xf32>, vector<128x128xf32>, vector<256x128xf32> -> vector<256x128xf32>
    %c0_3 = arith.constant 0 : index
    %c0_4 = arith.constant 0 : index
    %3 = vector.load %arg3[%c0_3, %c0_4] : memref<1x128xf32, #tpu.memory_space<vmem>>, vector<1x128xf32>
    %4 = vector.broadcast %3 : vector<1x128xf32> to vector<256x128xf32>
    %5 = arith.addf %2, %4 : vector<256x128xf32>
    %6 = vector.extract_strided_slice %5 {offsets = [0, 0], sizes = [256, 64], strides = [1, 1]} : vector<256x128xf32> to vector<256x64xf32>
    %7 = math.tanh %6 : vector<256x64xf32>
    %8 = vector.extract_strided_slice %5 {offsets = [0, 64], sizes = [256, 64], strides = [1, 1]} : vector<256x128xf32> to vector<256x64xf32>
    %9 = arith.negf %8 : vector<256x64xf32>
    %10 = math.exp %9 : vector<256x64xf32>
    %cst_5 = arith.constant 1.000000e+00 : f32
    %11 = vector.broadcast %cst_5 : f32 to vector<256x64xf32>
    %12 = arith.addf %11, %10 : vector<256x64xf32>
    %13 = arith.divf %11, %12 : vector<256x64xf32>
    %14 = arith.mulf %7, %13 : vector<256x64xf32>
    %c0_6 = arith.constant 0 : index
    %c0_7 = arith.constant 0 : index
    %15 = vector.load %arg4[%c0_6, %c0_7] : memref<64x1xf32, #tpu.memory_space<vmem>>, vector<64x1xf32>
    %cst_8 = arith.constant dense<0.000000e+00> : vector<1x256xf32>
    %16 = tpu.matmul %15, %14, %cst_8 {dimension_numbers = #tpu.dot_dimension_numbers<[0], [1], [1], [0], [0, 1, 1, 0], [], []>} : vector<64x1xf32>, vector<256x64xf32>, vector<1x256xf32> -> vector<1x256xf32>
    %c0_9 = arith.constant 0 : index
    %c0_10 = arith.constant 0 : index
    %17 = vector.load %arg5[%c0_9, %c0_10] : memref<1x1xf32, #tpu.memory_space<vmem>>, vector<1x1xf32>
    %18 = vector.broadcast %17 : vector<1x1xf32> to vector<1x256xf32>
    %19 = arith.addf %16, %18 : vector<1x256xf32>
    %c0_11 = arith.constant 0 : index
    %c0_12 = arith.constant 0 : index
    %20 = vector.load %arg6[%c0_11, %c0_12] : memref<1x256xf32, #tpu.memory_space<vmem>>, vector<1x256xf32>
    tpu.vector_store %arg6[%c0_11, %c0_12], %19 {strides = array<i32>} : memref<1x256xf32, #tpu.memory_space<vmem>>, vector<1x256xf32>,
    return
  }
  func.func @transform_0(%arg0: i32) -> (i32, i32) {
    %c0_i32 = arith.constant 0 : i32
    %c0_i32_0 = arith.constant 0 : i32
    return %arg0, %c0_i32 : i32, i32
  }
  func.func @transform_1(%arg0: i32) -> (i32, i32) {
    %c0_i32 = arith.constant 0 : i32
    %c0_i32_0 = arith.constant 0 : i32
    %c0_i32_1 = arith.constant 0 : i32
    return %c0_i32, %c0_i32_0 : i32, i32
  }
  func.func @transform_2(%arg0: i32) -> (i32, i32) {
    %c0_i32 = arith.constant 0 : i32
    %c0_i32_0 = arith.constant 0 : i32
    %c0_i32_1 = arith.constant 0 : i32
    return %c0_i32, %c0_i32_0 : i32, i32
  }
  func.func @transform_3(%arg0: i32) -> (i32, i32) {
    %c0_i32 = arith.constant 0 : i32
    %c0_i32_0 = arith.constant 0 : i32
    %c0_i32_1 = arith.constant 0 : i32
    return %c0_i32, %c0_i32_0 : i32, i32
  }
  func.func @transform_4(%arg0: i32) -> (i32, i32) {
    %c0_i32 = arith.constant 0 : i32
    %c0_i32_0 = arith.constant 0 : i32
    %c0_i32_1 = arith.constant 0 : i32
    return %c0_i32, %c0_i32_0 : i32, i32
  }
  func.func @transform_5(%arg0: i32) -> (i32, i32) {
    %c0_i32 = arith.constant 0 : i32
    %c0_i32_0 = arith.constant 0 : i32
    return %c0_i32, %arg0 : i32, i32
  }
}

</mosaic_0001>

<bundles_post_ra>
// kernel: dattn_net_gated.1
= control target key start
LH: loop header
LB: loop body
LE: loop exit
PB: predicated region body
PF: predicated region fallthrough
CT: control target
= control target key end

     0   :  { %s1754_s20 = smov 0   ;;  %s2123_s0 = inlined_call_operand.vmem [shape: f32[512,128], index: 0, kind: input, shape index: {}]   ;;  %s2124_s1 = inlined_call_operand.vmem [shape: f32[128,128], index: 1, kind: input, shape index: {}]   ;;  %s2125_s2 = inlined_call_operand.vmem [shape: f32[1,128], index: 2, kind: input, shape index: {}]   ;;  %s2126_s3 = inlined_call_operand.vmem [shape: f32[64,1], index: 3, kind: input, shape index: {}]   ;;  %s2127_s4 = inlined_call_operand.<no memory space> [shape: f32[1,1], index: 4, kind: input, shape index: {}]   ;;  %s2128_s5 = inlined_call_operand.vmem [shape: f32[1,512], index: 5, kind: output, shape index: {}]  }
   0x1   :  { %v10_v0 = vstv %s2127_s4 }
   0x2   :  { %11 = vst [vmem:[#allocation2] sm:$0x1] %v10_v0 }
   0x3 LB: > { %s1186_s21 = sadd.s32 4294967295, %s1716_s20   ;;  %p1190_p0 = scmp.ge.s32.totalorder %s1716_s20, 1  ;;  %s1716_s20 = sphi %s1754_s20, %s17_s20  }
   0x4   : > { %p190_p1 = scmp.lt.s32.totalorder %s1716_s20, 3 }
   0x6   : > { %p191_p2 = pnand %p1190_p0, %p190_p1 }
   0x7   : > { %v260_v1 = vld [vmem:[%s2124_s1] sm:$0xff] (!%p191_p2)  ;;  %v261_v2 = vld [vmem:[%s2124_s1 + $0x8] sm:$0xff] (!%p191_p2)  ;;  %v262_v3 = vld [vmem:[%s2124_s1 + $0x10] sm:$0xff] (!%p191_p2)  ;;  %s1191_s27 = sshll.u32 (!%p191_p2), %s1186_s21, 5  ;;  %s1718_s11 = smov (!%p191_p2), 64   ;;  %vm942_vm0 = vcmask (!%p191_p2), 523264  }
   0x8   : > { %194 = sbr.rel (%p191_p2) target bundleno = 756 (0x2f4), region = 40  ;;  %v1424_v4 = vpack.c.bf16 (!%p191_p2), %v261_v2, %v260_v1  ;;  %v263_v5 = vld [vmem:[%s2124_s1 + $0x18] sm:$0xff] (!%p191_p2)  ;;  %p218_p3 = scmp.lt.s32.totalorder (!%p191_p2), %s1191_s27, 63  ;;  %v264_v7 = vld [vmem:[%s2124_s1 + $0x20] sm:$0xff] (!%p191_p2)  ;;  %v265_v8 = vld [vmem:[%s2124_s1 + $0x28] sm:$0xff] (!%p191_p2) }
   0x9   : > { %v1428_v6 = vpack.c.bf16 (!%p191_p2), %v263_v5, %v262_v3  ;;  %v1432_v9 = vpack.c.bf16 (!%p191_p2), %v265_v8, %v264_v7  ;;  %v266_v10 = vld [vmem:[%s2124_s1 + $0x30] sm:$0xff] (!%p191_p2)  ;;  %v267_v11 = vld [vmem:[%s2124_s1 + $0x38] sm:$0xff] (!%p191_p2)  ;;  %v268_v14 = vld [vmem:[%s2124_s1 + $0x40] sm:$0xff] (!%p191_p2)  ;;  %s1193_s29 = sshll.u32 (!%p191_p2), %s1186_s21, 1 }
   0xa   : > { %1425 = vmatprep.subr.bf16.mxu0 (!%p191_p2), %v1424_v4  ;;  %v1436_v13 = vpack.c.bf16 (!%p191_p2), %v267_v11, %v266_v10  ;;  %v269_v15 = vld [vmem:[%s2124_s1 + $0x48] sm:$0xff] (!%p191_p2)  ;;  %v270_v17 = vld [vmem:[%s2124_s1 + $0x50] sm:$0xff] (!%p191_p2)  ;;  %v271_v18 = vld [vmem:[%s2124_s1 + $0x58] sm:$0xff] (!%p191_p2)  ;;  %p224_p4 = scmp.lt.s32.totalorder (!%p191_p2), %s1193_s29, 3 }
   0xb   : > { %1427 = vmatpush3.bf16.msra.mxu0 (!%p191_p2), %v1424_v4  ;;  %v1440_v16 = vpack.c.bf16 (!%p191_p2), %v269_v15, %v268_v14  ;;  %v1444_v19 = vpack.c.bf16 (!%p191_p2), %v271_v18, %v270_v17  ;;  %v272_v20 = vld [vmem:[%s2124_s1 + $0x60] sm:$0xff] (!%p191_p2)  ;;  %v273_v21 = vld [vmem:[%s2124_s1 + $0x68] sm:$0xff] (!%p191_p2)  ;;  %v274_v23 = vld [vmem:[%s2124_s1 + $0x70] sm:$0xff] (!%p191_p2) }
   0xc   : > { %1429 = vmatprep.subr.bf16.mxu0 (!%p191_p2), %v1428_v6  ;;  %v1448_v22 = vpack.c.bf16 (!%p191_p2), %v273_v21, %v272_v20  ;;  %v275_v24 = vld [vmem:[%s2124_s1 + $0x78] sm:$0xff] (!%p191_p2)  ;;  %v1852_v57 = vld [vmem:[%s2125_s2] ss:$0 sm:$0xff] (!%p191_p2)  ;;  %vm2052_vm1 = vmpackc.low (!%p191_p2), %vm942_vm0, %vm942_vm0 }
   0xd   : > { %v1452_v25 = vpack.c.bf16 (!%p191_p2), %v275_v24, %v274_v23 }
   0xf   : > { %s2132_s27 = smov (!%p218_p3, %s1191_s27), 63  ;;  %1431 = vmatpush3.bf16.msra.mxu0 %v1428_v6  ;;  %s2134_s29 = smov (!%p224_p4, %s1193_s29), 3 }
  0x10   : > { %s1192_s9 = sshll.u32 %s2132_s27, 3  ;;  %1433 = vmatprep.subr.bf16.mxu0 %v1432_v9  ;;  %s226_s7 = scalar_lea.vmem %s2128_s5, %s2134_s29 }
  0x11   : > { %s1791_s16 = scalar_lea.vmem %s2123_s0, %s1192_s9 }
  0x12   : > { %v228_v12 = vld [vmem:[%s1791_s16] sm:$0xff]  ;;  %v229_v26 = vld [vmem:[%s1791_s16 + $0x8] sm:$0xff]  ;;  %v230_v27 = vld [vmem:[%s1791_s16 + $0x10] sm:$0xff] }
  0x13   : > { %1376 = vmatprep.mubr.f32.mxu0 %v228_v12  ;;  %1435 = vmatpush3.bf16.msra.mxu0 %v1432_v9  ;;  %v231_v28 = vld [vmem:[%s1791_s16 + $0x18] sm:$0xff]  ;;  %v232_v29 = vld [vmem:[%s1791_s16 + $0x20] sm:$0xff]  ;;  %v233_v30 = vld [vmem:[%s1791_s16 + $0x28] sm:$0xff] }
  0x14   : > { %1437 = vmatprep.subr.bf16.mxu0 %v1436_v13  ;;  %v234_v31 = vld [vmem:[%s1791_s16 + $0x30] sm:$0xff]  ;;  %v235_v32 = vld [vmem:[%s1791_s16 + $0x38] sm:$0xff]  ;;  %v236_v33 = vld [vmem:[%s1791_s16 + $0x40] sm:$0xff] }
  0x15   : > { %v237_v34 = vld [vmem:[%s1791_s16 + $0x48] sm:$0xff]  ;;  %v238_v35 = vld [vmem:[%s1791_s16 + $0x50] sm:$0xff]  ;;  %v239_v36 = vld [vmem:[%s1791_s16 + $0x58] sm:$0xff] }
  0x16   : > { %v240_v37 = vld [vmem:[%s1791_s16 + $0x60] sm:$0xff]  ;;  %v241_v38 = vld [vmem:[%s1791_s16 + $0x68] sm:$0xff]  ;;  %v242_v39 = vld [vmem:[%s1791_s16 + $0x70] sm:$0xff] }
  0x17   : > { %1439 = vmatpush3.bf16.msra.mxu0 %v1436_v13  ;;  %v243_v40 = vld [vmem:[%s1791_s16 + $0x78] sm:$0xff]  ;;  %v244_v41 = vld [vmem:[%s1791_s16 + $0x80] sm:$0xff]  ;;  %v245_v42 = vld [vmem:[%s1791_s16 + $0x88] sm:$0xff] }
  0x18   : > { %1441 = vmatprep.subr.bf16.mxu0 %v1440_v16  ;;  %v246_v43 = vld [vmem:[%s1791_s16 + $0x90] sm:$0xff]  ;;  %v247_v44 = vld [vmem:[%s1791_s16 + $0x98] sm:$0xff]  ;;  %v248_v45 = vld [vmem:[%s1791_s16 + $0xa0] sm:$0xff] }
  0x19   : > { %v249_v46 = vld [vmem:[%s1791_s16 + $0xa8] sm:$0xff]  ;;  %v250_v47 = vld [vmem:[%s1791_s16 + $0xb0] sm:$0xff]  ;;  %v251_v48 = vld [vmem:[%s1791_s16 + $0xb8] sm:$0xff] }
  0x1a   : > { %v252_v49 = vld [vmem:[%s1791_s16 + $0xc0] sm:$0xff]  ;;  %v253_v50 = vld [vmem:[%s1791_s16 + $0xc8] sm:$0xff]  ;;  %v254_v51 = vld [vmem:[%s1791_s16 + $0xd0] sm:$0xff] }
  0x1b   : > { %1443 = vmatpush3.bf16.msra.mxu0 %v1440_v16  ;;  %v255_v52 = vld [vmem:[%s1791_s16 + $0xd8] sm:$0xff]  ;;  %v256_v53 = vld [vmem:[%s1791_s16 + $0xe0] sm:$0xff]  ;;  %v257_v54 = vld [vmem:[%s1791_s16 + $0xe8] sm:$0xff] }
  0x1c   : > { %1445 = vmatprep.subr.bf16.mxu0 %v1444_v19  ;;  %v258_v55 = vld [vmem:[%s1791_s16 + $0xf0] sm:$0xff]  ;;  %v259_v56 = vld [vmem:[%s1791_s16 + $0xf8] sm:$0xff] }
  0x1f   : > { %1447 = vmatpush3.bf16.msra.mxu0 %v1444_v19 }
  0x20   : > { %1449 = vmatprep.subr.bf16.mxu0 %v1448_v22 }
  0x23   : > { %1451 = vmatpush3.bf16.msra.mxu0 %v1448_v22 }
  0x24   : > { %1453 = vmatprep.subr.bf16.mxu0 %v1452_v25 }
  0x27   : > { %1455 = vmatpush3.bf16.msra.mxu0 %v1452_v25 }
  0x2a   : > { %1377 = vmatmul.mubr.f32.vlgmr.msra.gmra.mrb[0].mxu0 %v229_v26 }
  0x2b   : > { %1379 = vmatprep.mubr.f32.mxu0 %v230_v27 }
  0x2e   : > { %1380 = vmatmul.mubr.f32.gmra.mrb[2].mxu0 %v231_v28 }
  0x2f   : > { %1382 = vmatprep.mubr.f32.mxu0 %v232_v29 }
  0x32   : > { %1383 = vmatmul.mubr.f32.gmra.mrb[4].mxu0 %v233_v30 }
  0x33   : > { %1385 = vmatprep.mubr.f32.mxu0 %v234_v31 }
  0x36   : > { %1386 = vmatmul.mubr.f32.gmra.mrb[6].mxu0 %v235_v32 }
  0x37   : > { %1388 = vmatprep.mubr.f32.mxu0 %v236_v33 }
  0x3a   : > { %1389 = vmatmul.mubr.f32.gmra.mrb[8].mxu0 %v237_v34 }
  0x3b   : > { %1391 = vmatprep.mubr.f32.mxu0 %v238_v35 }
  0x3e   : > { %1392 = vmatmul.mubr.f32.gmra.mrb[10].mxu0 %v239_v36 }
  0x3f   : > { %1394 = vmatprep.mubr.f32.mxu0 %v240_v37 }
  0x42   : > { %1395 = vmatmul.mubr.f32.gmra.mrb[12].mxu0 %v241_v38 }
  0x43   : > { %1397 = vmatprep.mubr.f32.mxu0 %v242_v39 }
  0x46   : > { %1398 = vmatmul.mubr.f32.gmra.mrb[14].mxu0 %v243_v40 }
  0x47   : > { %1400 = vmatprep.mubr.f32.mxu0 %v244_v41 }
  0x4a   : > { %1401 = vmatmul.mubr.f32.gmra.mrb[16].mxu0 %v245_v42 }
  0x4b   : > { %1403 = vmatprep.mubr.f32.mxu0 %v246_v43 }
  0x4e   : > { %1404 = vmatmul.mubr.f32.gmra.mrb[18].mxu0 %v247_v44 }
  0x4f   : > { %1406 = vmatprep.mubr.f32.mxu0 %v248_v45 }
  0x52   : > { %1407 = vmatmul.mubr.f32.gmra.mrb[20].mxu0 %v249_v46 }
  0x53   : > { %1409 = vmatprep.mubr.f32.mxu0 %v250_v47 }
  0x56   : > { %1410 = vmatmul.mubr.f32.gmra.mrb[22].mxu0 %v251_v48 }
  0x57   : > { %1412 = vmatprep.mubr.f32.mxu0 %v252_v49 }
  0x5a   : > { %1413 = vmatmul.mubr.f32.gmra.mrb[24].mxu0 %v253_v50 }
  0x5b   : > { %1415 = vmatprep.mubr.f32.mxu0 %v254_v51 }
  0x5e   : > { %1416 = vmatmul.mubr.f32.gmra.mrb[26].mxu0 %v255_v52 }
  0x5f   : > { %1418 = vmatprep.mubr.f32.mxu0 %v256_v53 }
  0x62   : > { %1419 = vmatmul.mubr.f32.gmra.mrb[28].mxu0 %v257_v54 }
  0x63   : > { %1421 = vmatprep.mubr.f32.mxu0 %v258_v55 }
  0x66   : > { %1422 = vmatmul.mubr.f32.gmra.mrb[30].mxu0 %v259_v56 }
  0xfd   : > { %v1378_v58 = vpop.f32.mrb[0].mxu0 }
  0xfe   : > { %v1855_v59 = vadd.f32 %v1378_v58, %v1852_v57  ;;  %v349_v60 = vpop.f32.mrb[1].mxu0 }
  0xff   : > { %v1858_v61 = vadd.f32 %v1852_v57, %v349_v60 }
 0x100   : > { %v1196_v62 = vmul.f32 -1.442695, %v1855_v59 }
 0x101   : > { %v1195_v63 = vmul.f32 -1.442695, %v1858_v61  ;;  %v1381_v0 = vpop.f32.mrb[2].mxu0 }
 0x102   : > { %1518 = vpow2.f32 %v1196_v62  ;;  %v359_v1 = vpop.f32.mrb[3].mxu0  ;;  %v1899_v38 = vadd.f32 %v1381_v0, %v1852_v57 }
 0x103   : > { %1520 = vpow2.f32 %v1195_v63  ;;  %v1863_v2 = vadd.f32 %v1852_v57, %v359_v1 }
 0x104   : > { %v1198_v42 = vmul.f32 -1.442695, %v1899_v38 }
 0x105   : > { %v1197_v3 = vmul.f32 -1.442695, %v1863_v2  ;;  %v1866_v4 = vpop.f32.mrb[4].mxu0 }
 0x106   : > { %v369_v5 = vpop.f32.mrb[5].mxu0  ;;  %v1931_v58 = vadd.f32 %v1866_v4, %v1852_v57 }
 0x107   : > { %1522 = vpow2.f32 %v1197_v3  ;;  %v1909_v44 = vadd.f32 %v1852_v57, %v369_v5 }
 0x109   : > { %v1387_v6 = vpop.f32.mrb[6].mxu0  ;;  %v1199_v52 = vmul.f32 -1.442695, %v1909_v44 }
 0x10a   : > { %v1869_v7 = vadd.f32 %v1387_v6, %v1852_v57  ;;  %v379_v8 = vpop.f32.mrb[7].mxu0  ;;  %v1200_v6 = vmul.f32 -1.442695, %v1931_v58 }
 0x10b   : > { %v1938_v63 = vadd.f32 %v1852_v57, %v379_v8 }
 0x10c   : > { %v1519_v9 = vpop.eup %1518 }
 0x10d   : > { %v1521_v10 = vpop.eup %1520  ;;  %v637_v11 = vadd.f32 1.0, %v1519_v9  ;;  %v1390_v12 = vpop.f32.mrb[8].mxu0  ;;  %v1201_v8 = vmul.f32 -1.442695, %v1938_v63 }
 0x10e   : > { %v1872_v13 = vadd.f32 %v1390_v12, %v1852_v57  ;;  %v389_v14 = vpop.f32.mrb[9].mxu0  ;;  %v636_v15 = vadd.f32 1.0, %v1521_v10 }
 0x10f   : > { %1524 = vrcp.f32 %v637_v11  ;;  %v1875_v16 = vadd.f32 %v1852_v57, %v389_v14 }
 0x110   : > { %1526 = vrcp.f32 %v636_v15 }
 0x111   : > { %v1523_v17 = vpop.eup %1522  ;;  %v1393_v18 = vpop.f32.mrb[10].mxu0 }
 0x112   : > { %v638_v19 = vadd.f32 1.0, %v1523_v17  ;;  %v1878_v20 = vadd.f32 %v1393_v18, %v1852_v57  ;;  %v399_v21 = vpop.f32.mrb[11].mxu0 }
 0x113   : > { %v1881_v22 = vadd.f32 %v1852_v57, %v399_v21 }
 0x114   : > { %1528 = vrcp.f32 %v638_v19  ;;  %v1202_v19 = vmul.f32 -1.442695, %v1869_v7 }
 0x115   : > { %v1396_v23 = vpop.f32.mrb[12].mxu0  ;;  %1530 = vpow2.f32 %v1198_v42 }
 0x116   : > { %v1884_v24 = vadd.f32 %v1396_v23, %v1852_v57  ;;  %v409_v25 = vpop.f32.mrb[13].mxu0 }
 0x117   : > { %v1887_v26 = vadd.f32 %v1852_v57, %v409_v25 }
 0x119   : > { %v1525_v27 = vpop.eup %1524  ;;  %v1399_v28 = vpop.f32.mrb[14].mxu0 }
 0x11a   : > { %v1890_v29 = vadd.f32 %v1399_v28, %v1852_v57  ;;  %766 = vrot.lane.b32.xlu1 %v1525_v27, %s1718_s11  ;;  %v419_v30 = vpop.f32.mrb[15].mxu0  ;;  %v1527_v32 = vpop.eup %1526 }
 0x11b   : > { %v1894_v31 = vadd.f32 %v1852_v57, %v419_v30 }
 0x11d   : > { %v1402_v33 = vpop.f32.mrb[16].mxu0 }
 0x11e   : > { %v1529_v34 = vpop.eup %1528  ;;  %v429_v35 = vpop.f32.mrb[17].mxu0  ;;  %764 = vrot.lane.b32.xlu1 %v1527_v32, %s1718_s11  ;;  %v1902_v39 = vadd.f32 %v1402_v33, %v1852_v57 }
 0x11f   : > { %768 = vrot.lane.b32.xlu0 %v1529_v34, %s1718_s11  ;;  %v1906_v43 = vadd.f32 %v1852_v57, %v429_v35  ;;  %v1531_v14 = vpop.eup %1530 }
 0x120   : > { %v1212_v45 = vmul.f32 -1.442695, %v1902_v39  ;;  %v639_v27 = vadd.f32 1.0, %v1531_v14 }
 0x121   : > { %v1405_v36 = vpop.f32.mrb[18].mxu0  ;;  %v1211_v51 = vmul.f32 -1.442695, %v1906_v43 }
 0x122   : > { %v439_v37 = vpop.f32.mrb[19].mxu0  ;;  %v1916_v49 = vadd.f32 %v1405_v36, %v1852_v57  ;;  %1532 = vpow2.f32 %v1212_v45 }
 0x123   : > { %v1924_v54 = vadd.f32 %v1852_v57, %v439_v37  ;;  %1534 = vpow2.f32 %v1211_v51 }
 0x124   : > { %v1214_v60 = vmul.f32 -1.442695, %v1916_v49  ;;  %1536 = vpow2.f32 %v1199_v52 }
 0x125   : > { %v1408_v40 = vpop.f32.mrb[20].mxu0  ;;  %v1213_v3 = vmul.f32 -1.442695, %v1924_v54 }
 0x126   : > { %v449_v41 = vpop.f32.mrb[21].mxu0  ;;  %v1941_v0 = vadd.f32 %v1408_v40, %v1852_v57  ;;  %1538 = vpow2.f32 %v1214_v60  ;;  %v1204_v60 = vmul.f32 -1.442695, %v1872_v13 }
 0x127   : > { %v1953_v10 = vadd.f32 %v1852_v57, %v449_v41  ;;  %1540 = vpow2.f32 %v1213_v3  ;;  %v1203_v41 = vmul.f32 -1.442695, %v1875_v16 }
 0x128   : > { %v1216_v11 = vmul.f32 -1.442695, %v1941_v0  ;;  %1542 = vpow2.f32 %v1200_v6 }
 0x129   : > { %v1411_v46 = vpop.f32.mrb[22].mxu0  ;;  %1544 = vpow2.f32 %v1201_v8  ;;  %v1215_v25 = vmul.f32 -1.442695, %v1953_v10  ;;  %v1205_v8 = vmul.f32 -1.442695, %v1881_v22 }
 0x12a   : > { %v1913_v47 = vadd.f32 %v1411_v46, %v1852_v57  ;;  %v459_v48 = vpop.f32.mrb[23].mxu0  ;;  %1546 = vpow2.f32 %v1216_v11 }
 0x12b   : > { %v1919_v50 = vadd.f32 %v1852_v57, %v459_v48 }
 0x12c   : > { %v1533_v18 = vpop.eup %1532  ;;  %v1218_v36 = vmul.f32 -1.442695, %v1913_v47 }
 0x12d   : > { %v1414_v53 = vpop.f32.mrb[24].mxu0  ;;  %v653_v23 = vadd.f32 1.0, %v1533_v18  ;;  %v1535_v30 = vpop.eup %1534  ;;  %v1217_v46 = vmul.f32 -1.442695, %v1919_v50 }
 0x12e   : > { %v1927_v55 = vadd.f32 %v1414_v53, %v1852_v57  ;;  %v469_v56 = vpop.f32.mrb[25].mxu0  ;;  %v1537_v34 = vpop.eup %1536  ;;  %v652_v35 = vadd.f32 1.0, %v1535_v30 }
 0x12f   : > { %v1935_v62 = vadd.f32 %v1852_v57, %v469_v56  ;;  %1548 = vrcp.f32 %v653_v23  ;;  %v640_v42 = vadd.f32 1.0, %v1537_v34 }
 0x130   : > { %1550 = vpow2.f32 %v1202_v19  ;;  %v1539_v40 = vpop.eup %1538  ;;  %v1220_v53 = vmul.f32 -1.442695, %v1927_v55 }
 0x131   : > { %v1417_v1 = vpop.f32.mrb[26].mxu0  ;;  %1552 = vpow2.f32 %v1215_v25  ;;  %v655_v45 = vadd.f32 1.0, %v1539_v40  ;;  %v1541_v48 = vpop.eup %1540  ;;  %v1207_v40 = vmul.f32 -1.442695, %v1887_v26 }
 0x132   : > { %v1945_v5 = vadd.f32 %v1417_v1, %v1852_v57  ;;  %v479_v4 = vpop.f32.mrb[27].mxu0  ;;  %1554 = vrcp.f32 %v639_v27  ;;  %v1543_v51 = vpop.eup %1542  ;;  %v654_v52 = vadd.f32 1.0, %v1541_v48 }
 0x133   : > { %v1949_v9 = vadd.f32 %v1852_v57, %v479_v4  ;;  %1556 = vrcp.f32 %v652_v35  ;;  %v641_v3 = vadd.f32 1.0, %v1543_v51  ;;  %v1206_v35 = vmul.f32 -1.442695, %v1878_v20 }
 0x134   : > { %1558 = vpow2.f32 %v1218_v36  ;;  %v1222_v25 = vmul.f32 -1.442695, %v1945_v5 }
 0x135   : > { %v1420_v12 = vpop.f32.mrb[28].mxu0  ;;  %1560 = vrcp.f32 %v655_v45 }
 0x136   : > { %v1957_v15 = vadd.f32 %v1420_v12, %v1852_v57  ;;  %v489_v17 = vpop.f32.mrb[29].mxu0  ;;  %1562 = vpow2.f32 %v1203_v41 }
 0x137   : > { %v1961_v21 = vadd.f32 %v1852_v57, %v489_v17  ;;  %1564 = vrcp.f32 %v640_v42  ;;  %v1219_v17 = vmul.f32 -1.442695, %v1935_v62 }
 0x138   : > { %1566 = vpow2.f32 %v1217_v46  ;;  %v1221_v46 = vmul.f32 -1.442695, %v1949_v9 }
 0x139   : > { %v1423_v28 = vpop.f32.mrb[30].mxu0  ;;  %1568 = vrcp.f32 %v654_v52 }
 0x13a   : > { %v1965_v32 = vadd.f32 %v1423_v28, %v1852_v57  ;;  %v499_v33 = vpop.f32.mrb[31].mxu0  ;;  %1570 = vpow2.f32 %v1220_v53  ;;  %v1224_v53 = vmul.f32 -1.442695, %v1957_v15 }
 0x13b   : > { %v1969_v37 = vadd.f32 %v1852_v57, %v499_v33  ;;  %v1545_v57 = vpop.eup %1544 }
 0x13c   : > { %v1547_v56 = vpop.eup %1546  ;;  %v642_v12 = vadd.f32 1.0, %v1545_v57 }
 0x13d   : > { %v1549_v1 = vpop.eup %1548  ;;  %v657_v4 = vadd.f32 1.0, %v1547_v56 }
 0x13e   : > { %v1551_v6 = vpop.eup %1550  ;;  %798 = vrot.lane.b32.xlu0 %v1549_v1, %s1718_s11  ;;  %v1208_v1 = vmul.f32 -1.442695, %v1884_v24 }
 0x13f   : > { %v1553_v11 = vpop.eup %1552  ;;  %1572 = vrcp.f32 %v657_v4  ;;  %v643_v33 = vadd.f32 1.0, %v1551_v6 }
 0x140   : > { %v1555_v14 = vpop.eup %1554  ;;  %1574 = vpow2.f32 %v1204_v60  ;;  %v656_v19 = vadd.f32 1.0, %v1553_v11 }
 0x141   : > { %v1557_v18 = vpop.eup %1556  ;;  %1576 = vrcp.f32 %v641_v3 }
 0x142   : > { %v1559_v23 = vpop.eup %1558  ;;  %1578 = vpow2.f32 %v1205_v8  ;;  %796 = vrot.lane.b32.xlu0 %v1557_v18, %s1718_s11  ;;  %v1209_v8 = vmul.f32 -1.442695, %v1894_v31 }
 0x143   : > { %v1561_v27 = vpop.eup %1560  ;;  %1580 = vrcp.f32 %v642_v12  ;;  %v659_v28 = vadd.f32 1.0, %v1559_v23 }
 0x144   : > { %v1563_v30 = vpop.eup %1562  ;;  %802 = vrot.lane.b32.xlu1 %v1561_v27, %s1718_s11  ;;  %1582 = vpow2.f32 %v1219_v17  ;;  %v1223_v17 = vmul.f32 -1.442695, %v1961_v21 }
 0x145   : > { %v1565_v34 = vpop.eup %1564  ;;  %1584 = vrcp.f32 %v656_v19  ;;  %v644_v42 = vadd.f32 1.0, %v1563_v30 }
 0x146   : > { %v1567_v36 = vpop.eup %1566  ;;  %1586 = vpow2.f32 %v1222_v25  ;;  %772 = vrot.lane.b32.xlu0 %v1565_v34, %s1718_s11  ;;  %v1226_v25 = vmul.f32 -1.442695, %v1965_v32 }
 0x147   : > { %v1569_v41 = vpop.eup %1568  ;;  %1588 = vrcp.f32 %v659_v28  ;;  %v658_v51 = vadd.f32 1.0, %v1567_v36  ;;  %v1210_v36 = vmul.f32 -1.442695, %v1890_v29 }
 0x148   : > { %v1571_v45 = vpop.eup %1570  ;;  %1590 = vrcp.f32 %v643_v33  ;;  %770 = vrot.lane.b32.xlu1 %v1555_v14, %s1718_s11  ;;  %v1225_v33 = vmul.f32 -1.442695, %v1969_v37 }
 0x149   : > { %v1573_v48 = vpop.eup %1572  ;;  %1592 = vpow2.f32 %v1206_v35  ;;  %v661_v56 = vadd.f32 1.0, %v1571_v45 }
 0x14a   : > { %v1575_v52 = vpop.eup %1574  ;;  %1594 = vpow2.f32 %v1207_v40  ;;  %800 = vrot.lane.b32.xlu0 %v1569_v41, %s1718_s11 }
 0x14b   : > { %v1577_v57 = vpop.eup %1576  ;;  %1596 = vrcp.f32 %v644_v42  ;;  %v645_v4 = vadd.f32 1.0, %v1575_v52 }
 0x14c   : > { %v1579_v60 = vpop.eup %1578  ;;  %806 = vrot.lane.b32.xlu1 %v1573_v48, %s1718_s11  ;;  %1598 = vpow2.f32 %v1221_v46 }
 0x14d   : > { %v1581_v3 = vpop.eup %1580  ;;  %1600 = vrcp.f32 %v658_v51  ;;  %v646_v12 = vadd.f32 1.0, %v1579_v60 }
 0x14e   : > { %v1583_v6 = vpop.eup %1582  ;;  %1602 = vpow2.f32 %v1224_v53  ;;  %776 = vrot.lane.b32.xlu0 %v1581_v3, %s1718_s11 }
 0x14f   : > { %v1585_v11 = vpop.eup %1584  ;;  %1604 = vrcp.f32 %v661_v56  ;;  %v660_v19 = vadd.f32 1.0, %v1583_v6 }
 0x150   : > { %v1587_v14 = vpop.eup %1586  ;;  %1606 = vpow2.f32 %v1208_v1  ;;  %774 = vrot.lane.b32.xlu1 %v1577_v57, %s1718_s11 }
 0x151   : > { %v1589_v18 = vpop.eup %1588  ;;  %1608 = vrcp.f32 %v645_v4  ;;  %v663_v28 = vadd.f32 1.0, %v1587_v14 }
 0x152   : > { %v1591_v23 = vpop.eup %1590  ;;  %1610 = vpow2.f32 %v1209_v8  ;;  %804 = vrot.lane.b32.xlu0 %v1585_v11, %s1718_s11 }
 0x153   : > { %v1593_v27 = vpop.eup %1592  ;;  %1612 = vrcp.f32 %v646_v12 }
 0x154   : > { %v1595_v30 = vpop.eup %1594  ;;  %810 = vrot.lane.b32.xlu1 %v1589_v18, %s1718_s11  ;;  %1614 = vpow2.f32 %v1223_v17  ;;  %v647_v45 = vadd.f32 1.0, %v1593_v27 }
 0x155   : > { %v1597_v34 = vpop.eup %1596  ;;  %1616 = vrcp.f32 %v660_v19  ;;  %v648_v41 = vadd.f32 1.0, %v1595_v30 }
 0x156   : > { %v1599_v35 = vpop.eup %1598  ;;  %1618 = vpow2.f32 %v1226_v25  ;;  %780 = vrot.lane.b32.xlu0 %v1597_v34, %s1718_s11 }
 0x157   : > { %v1601_v40 = vpop.eup %1600  ;;  %1620 = vrcp.f32 %v663_v28  ;;  %v662_v48 = vadd.f32 1.0, %v1599_v35 }
 0x158   : > { %v1603_v42 = vpop.eup %1602  ;;  %778 = vrot.lane.b32.xlu1 %v1591_v23, %s1718_s11  ;;  %1622 = vpow2.f32 %v1225_v33 }
 0x159   : > { %v1605_v46 = vpop.eup %1604  ;;  %1624 = vpow2.f32 %v1210_v36  ;;  %v665_v53 = vadd.f32 1.0, %v1603_v42 }
 0x15a   : > { %v1607_v51 = vpop.eup %1606  ;;  %808 = vrot.lane.b32.xlu0 %v1601_v40, %s1718_s11  ;;  %1626 = vrcp.f32 %v648_v41 }
 0x15b   : > { %v1609_v52 = vpop.eup %1608  ;;  %1628 = vrcp.f32 %v647_v45  ;;  %v649_v6 = vadd.f32 1.0, %v1607_v51 }
 0x15c   : > { %v1611_v57 = vpop.eup %1610  ;;  %814 = vrot.lane.b32.xlu1 %v1605_v46, %s1718_s11  ;;  %1630 = vrcp.f32 %v662_v48 }
 0x15d   : > { %v1613_v56 = vpop.eup %1612  ;;  %v650_v3 = vadd.f32 1.0, %v1611_v57  ;;  %1632 = vrcp.f32 %v665_v53  ;;  %v892_v53 = vld [vmem:[%s2126_s3] sm:$0xff]  ;;  %v893_v57 = vld [vmem:[%s2126_s3 + $0x8] sm:$0xff] }
 0x15e   : > { %v1615_v60 = vpop.eup %1614  ;;  %784 = vrot.lane.b32.xlu0 %v1613_v56, %s1718_s11  ;;  %v900_v56 = vld [vmem:[#allocation2] sm:$0x1] }
 0x15f   : > { %v1617_v1 = vpop.eup %1616  ;;  %v664_v11 = vadd.f32 1.0, %v1615_v60  ;;  %1634 = vrcp.f32 %v650_v3  ;;  %v895_v60 = vld [vmem:[%s2126_s3 + $0x18] sm:$0xff]  ;;  %v897_v3 = vld [vmem:[%s2126_s3 + $0x28] sm:$0xff] }
 0x160   : > { %v1619_v4 = vpop.eup %1618  ;;  %782 = vrot.lane.b32.xlu1 %v1609_v52, %s1718_s11  ;;  %1636 = vrcp.f32 %v649_v6 }
 0x161   : > { %v1621_v8 = vpop.eup %1620  ;;  %v667_v14 = vadd.f32 1.0, %v1619_v4  ;;  %1638 = vrcp.f32 %v664_v11  ;;  %v898_v4 = vld [vmem:[%s2126_s3 + $0x30] sm:$0xff] }
 0x162   : > { %v1623_v12 = vpop.eup %1622  ;;  %812 = vrot.lane.b32.xlu0 %v1617_v1, %s1718_s11  ;;  %v896_v1 = vld [vmem:[%s2126_s3 + $0x20] sm:$0xff] }
 0x163   : > { %v1625_v17 = vpop.eup %1624  ;;  %v666_v19 = vadd.f32 1.0, %v1623_v12  ;;  %1640 = vrcp.f32 %v667_v14 }
 0x164   : > { %818 = vrot.lane.b32.xlu1 %v1621_v8, %s1718_s11  ;;  %v1627_v18 = vpop.eup %1626  ;;  %v651_v28 = vadd.f32 1.0, %v1625_v17  ;;  %v899_v8 = vld [vmem:[%s2126_s3 + $0x38] sm:$0xff] }
 0x165   : > { %v1629_v23 = vpop.eup %1628  ;;  %1642 = vrcp.f32 %v666_v19 }
 0x166   : > { %788 = vrot.lane.b32.xlu0 %v1627_v18, %s1718_s11  ;;  %v1631_v25 = vpop.eup %1630  ;;  %1644 = vrcp.f32 %v651_v28 }
 0x167   : > { %v1633_v27 = vpop.eup %1632  ;;  %1646 = vtanh.f32 %v1855_v59  ;;  %v1719_v59 = vmov 0  }
 0x168   : > { %786 = vrot.lane.b32.xlu1 %v1629_v23, %s1718_s11  ;;  %1648 = vtanh.f32 %v1858_v61  ;;  %v894_v61 = vld [vmem:[%s2126_s3 + $0x10] sm:$0xff] }
 0x169   : > { %v1635_v30 = vpop.eup %1634  ;;  %1516 = vset.pattern.permute.xlu1 %v1719_v59  ;;  %1650 = vtanh.f32 %v1902_v39 }
 0x16a   : > { %816 = vrot.lane.b32.xlu0 %v1631_v25, %s1718_s11  ;;  %v1637_v33 = vpop.eup %1636  ;;  %1652 = vtanh.f32 %v1906_v43 }
 0x16b   : > { %v1639_v34 = vpop.eup %1638  ;;  %1654 = vtanh.f32 %v1899_v38 }
 0x16c   : > { %822 = vrot.lane.b32.xlu1 %v1633_v27, %s1718_s11  ;;  %1656 = vtanh.f32 %v1863_v2 }
 0x16d   : > { %v1641_v35 = vpop.eup %1640  ;;  %1658 = vtanh.f32 %v1916_v49 }
 0x16e   : > { %792 = vrot.lane.b32.xlu0 %v1635_v30, %s1718_s11  ;;  %1660 = vtanh.f32 %v1924_v54 }
 0x16f   : > { %v1643_v36 = vpop.eup %1642  ;;  %1662 = vtanh.f32 %v1931_v58 }
 0x170   : > { %790 = vrot.lane.b32.xlu1 %v1637_v33, %s1718_s11  ;;  %v1645_v40 = vpop.eup %1644  ;;  %1664 = vtanh.f32 %v1909_v44 }
 0x171   : > { %v1647_v42 = vpop.eup %1646  ;;  %1666 = vtanh.f32 %v1941_v0 }
 0x172   : > { %820 = vrot.lane.b32.xlu0 %v1639_v34, %s1718_s11  ;;  %v1649_v45 = vpop.eup %1648  ;;  %1668 = vtanh.f32 %v1953_v10 }
 0x173   : > { %v1651_v39 = vpop.eup %1650  ;;  %1670 = vtanh.f32 %v1869_v7 }
 0x174   : > { %826 = vrot.lane.b32.xlu1 %v1641_v35, %s1718_s11  ;;  %v1653_v12 = vpop.eup %1652  ;;  %1672 = vtanh.f32 %v1938_v63 }
 0x175   : > { %v1655_v49 = vpop.eup %1654  ;;  %1674 = vtanh.f32 %v1913_v47 }
 0x176   : > { %824 = vrot.lane.b32.xlu0 %v1643_v36, %s1718_s11  ;;  %v1657_v54 = vpop.eup %1656  ;;  %1676 = vtanh.f32 %v1919_v50 }
 0x177   : > { %v1659_v25 = vpop.eup %1658  ;;  %1678 = vtanh.f32 %v1872_v13 }
 0x178   : > { %794 = vrot.lane.b32.xlu1 %v1645_v40, %s1718_s11  ;;  %v1661_v28 = vpop.eup %1660  ;;  %1680 = vtanh.f32 %v1875_v16 }
 0x179   : > { %v1663_v10 = vpop.eup %1662  ;;  %1682 = vtanh.f32 %v1927_v55 }
 0x17a   : > { %v1665_v40 = vpop.eup %1664  ;;  %1684 = vtanh.f32 %v1935_v62 }
 0x17b   : > { %1686 = vtanh.f32 %v1878_v20 }
 0x17c   : > { %903 = vperm.xlu1 %1516, %v900_v56   ;;  %1688 = vtanh.f32 %v1881_v22 }
 0x17d   : > { %1690 = vtanh.f32 %v1945_v5 }
 0x17e   : > { %1692 = vtanh.f32 %v1949_v9 }
 0x17f   : > { %1694 = vtanh.f32 %v1884_v24 }
 0x180   : > { %1696 = vtanh.f32 %v1887_v26 }
 0x18c   : > { %v767_v41 = vpop.permute.xlu1 %766 }
 0x18d   : > { %v861_v48 = vmul.f32 %v1647_v42, %v767_v41  ;;  %v1667_v42 = vpop.eup %1666  ;;  %1698 = vtanh.f32 %v1957_v15 }
 0x190   : > { %v765_v46 = vpop.permute.xlu1 %764 }
 0x191   : > { %v860_v51 = vmul.f32 %v1649_v45, %v765_v46  ;;  %v769_v6 = vpop.permute.xlu0 %768  ;;  %v1669_v46 = vpop.eup %1668  ;;  %1700 = vtanh.f32 %v1961_v21 }
 0x192   : > { %v862_v27 = vmul.f32 %v1657_v54, %v769_v6  ;;  %v1671_v50 = vpop.eup %1670  ;;  %1702 = vtanh.f32 %v1965_v32 }
 0x193   : > { %v1459_v52 = vpack.c.bf16 %v861_v48, %v860_v51  ;;  %v1673_v56 = vpop.eup %1672  ;;  %1704 = vtanh.f32 %v1969_v37 }
 0x194   : > { %910 = vxpose.xlu0.b32.start [1/8] (short) (narrow) %v892_v53, 8 }
 0x198   : > { %911 = vxpose.xlu0.b32.cont [2/8] (short) (narrow) %v893_v57, 8 }
 0x19c   : > { %912 = vxpose.xlu0.b32.cont [3/8] (short) (narrow) %v894_v61, 8 }
 0x1a0   : > { %913 = vxpose.xlu0.b32.cont [4/8] (short) (narrow) %v895_v60, 8  ;;  %v1675_v60 = vpop.eup %1674  ;;  %1706 = vtanh.f32 %v1890_v29 }
 0x1a4   : > { %914 = vxpose.xlu0.b32.cont [5/8] (short) (narrow) %v896_v1, 8 }
 0x1a8   : > { %915 = vxpose.xlu0.b32.cont [6/8] (short) (narrow) %v897_v3, 8  ;;  %v1677_v3 = vpop.eup %1676  ;;  %1708 = vtanh.f32 %v1894_v31 }
 0x1a9   : > { %v1679_v62 = vpop.eup %1678 }
 0x1ac   : > { %916 = vxpose.xlu0.b32.cont [7/8] (short) (narrow) %v898_v4, 8 }
 0x1b0   : > { %917 = vxpose.xlu0.b32.end [8/8] (short) (narrow) %v899_v8, 8  ;;  %v799_v11 = vpop.permute.xlu0 %798 }
 0x1b1   : > { %v877_v14 = vmul.f32 %v1651_v39, %v799_v11 }
 0x1b4   : > { %v797_v43 = vpop.permute.xlu0 %796 }
 0x1b5   : > { %v876_v17 = vmul.f32 %v1653_v12, %v797_v43  ;;  %v1681_v12 = vpop.eup %1680 }
 0x1b6   : > { %v803_v18 = vpop.permute.xlu1 %802 }
 0x1b7   : > { %v1456_v2 = vpack.c.bf16 %v877_v14, %v876_v17  ;;  %v879_v44 = vmul.f32 %v1659_v25, %v803_v18  ;;  %v1683_v14 = vpop.eup %1682 }
 0x1b8   : > { %v773_v38 = vpop.permute.xlu0 %772  ;;  %v1685_v18 = vpop.eup %1684 }
 0x1b9   : > { %1458 = vmatprep.subr.msk.bf16.mxu1 %vm2052_vm1, %v1456_v2  ;;  %v864_v45 = vmul.f32 %v1665_v40, %v773_v38  ;;  %v1687_v9 = vpop.eup %1686 }
 0x1ba   : > { %v771_v23 = vpop.permute.xlu1 %770  ;;  %1461 = vmatpush3.bf16.xpose.msk.msra.mxu1 %vm2052_vm1, %v1459_v52  ;;  %v1689_v25 = vpop.eup %1688 }
 0x1bb   : > { %v863_v58 = vmul.f32 %v1655_v49, %v771_v23  ;;  %v1691_v24 = vpop.eup %1690 }
 0x1bc   : > { %v801_v30 = vpop.permute.xlu0 %800  ;;  %v1693_v26 = vpop.eup %1692 }
 0x1bd   : > { %v1465_v33 = vpack.c.bf16 %v863_v58, %v862_v27  ;;  %v878_v34 = vmul.f32 %v1661_v28, %v801_v30 }
 0x1be   : > { %v807_v35 = vpop.permute.xlu1 %806 }
 0x1bf   : > { %v1462_v0 = vpack.c.bf16 %v879_v44, %v878_v34  ;;  %v881_v63 = vmul.f32 %v1667_v42, %v807_v35  ;;  %v1695_v35 = vpop.eup %1694 }
 0x1c0   : > { %v777_v36 = vpop.permute.xlu0 %776 }
 0x1c1   : > { %1464 = vmatprep.subr.msk.bf16.mxu1 %vm2052_vm1, %v1462_v0  ;;  %v866_v1 = vmul.f32 %v1673_v56, %v777_v36  ;;  %v1697_v0 = vpop.eup %1696 }
 0x1c2   : > { %v775_v41 = vpop.permute.xlu1 %774  ;;  %1467 = vmatpush3.bf16.xpose.msk.msra.mxu1 %vm2052_vm1, %v1465_v33  ;;  %v1699_v32 = vpop.eup %1698 }
 0x1c3   : > { %v865_v7 = vmul.f32 %v1663_v10, %v775_v41  ;;  %v1701_v37 = vpop.eup %1700 }
 0x1c4   : > { %v805_v48 = vpop.permute.xlu0 %804  ;;  %v1703_v31 = vpop.eup %1702 }
 0x1c5   : > { %v1471_v51 = vpack.c.bf16 %v865_v7, %v864_v45  ;;  %v880_v52 = vmul.f32 %v1669_v46, %v805_v48  ;;  %v1705_v48 = vpop.eup %1704 }
 0x1c6   : > { %v811_v53 = vpop.permute.xlu1 %810 }
 0x1c7   : > { %v1468_v47 = vpack.c.bf16 %v881_v63, %v880_v52  ;;  %v883_v16 = vmul.f32 %v1675_v60, %v811_v53 }
 0x1c8   : > { %v781_v57 = vpop.permute.xlu0 %780 }
 0x1c9   : > { %1470 = vmatprep.subr.msk.bf16.mxu1 %vm2052_vm1, %v1468_v47  ;;  %v868_v17 = vmul.f32 %v1681_v12, %v781_v57 }
 0x1ca   : > { %v779_v61 = vpop.permute.xlu1 %778  ;;  %1473 = vmatpush3.bf16.xpose.msk.msra.mxu1 %vm2052_vm1, %v1471_v51  ;;  %v1707_v51 = vpop.eup %1706 }
 0x1cb   : > { %v867_v13 = vmul.f32 %v1671_v50, %v779_v61  ;;  %v1709_v47 = vpop.eup %1708 }
 0x1cc   : > { %v809_v4 = vpop.permute.xlu0 %808 }
 0x1cd   : > { %v1477_v6 = vpack.c.bf16 %v867_v13, %v866_v1  ;;  %v882_v8 = vmul.f32 %v1677_v3, %v809_v4  ;;  %v906_v13 = vlaneseq }
 0x1ce   : > { %v815_v11 = vpop.permute.xlu1 %814 }
 0x1cf   : > { %v1474_v55 = vpack.c.bf16 %v883_v16, %v882_v8  ;;  %v885_v22 = vmul.f32 %v1683_v14, %v815_v11  ;;  %v907_v3 = vshrl.u32 %v906_v13, 7  ;;  %vm1133_vm2 = vcmp.lt.s32.totalorder %v906_v13, 256 }
 0x1d0   : > { %v785_v39 = vpop.permute.xlu0 %784 }
 0x1d1   : > { %1476 = vmatprep.subr.msk.bf16.mxu1 %vm2052_vm1, %v1474_v55  ;;  %v870_v58 = vmul.f32 %v1689_v25, %v785_v39  ;;  %v908_v4 = vsub.s32 0, %v907_v3 }
 0x1d2   : > { %v783_v43 = vpop.permute.xlu1 %782  ;;  %1479 = vmatpush3.bf16.xpose.msk.msra.mxu1 %vm2052_vm1, %v1477_v6  ;;  %v1720_v6 = vmov 1966171168  }
 0x1d3   : > { %v869_v20 = vmul.f32 %v1679_v62, %v783_v43  ;;  %v1117_v8 = vunpack.c.l.s4 %v1720_v6 }
 0x1d4   : > { %v813_v2 = vpop.permute.xlu0 %812 }
 0x1d5   : > { %v1483_v38 = vpack.c.bf16 %v869_v20, %v868_v17  ;;  %v884_v49 = vmul.f32 %v1685_v18, %v813_v2  ;;  %v1118_v55 = vunpack.c.0.s8 %v1117_v8 }
 0x1d6   : > { %v819_v54 = vpop.permute.xlu1 %818 }
 0x1d7   : > { %v1480_v5 = vpack.c.bf16 %v885_v22, %v884_v49  ;;  %v887_v15 = vmul.f32 %v1691_v24, %v819_v54  ;;  %v1121_v43 = vsub.s32 %v1118_v55, %v907_v3 }
 0x1d8   : > { %v789_v23 = vpop.permute.xlu0 %788 }
 0x1d9   : > { %1482 = vmatprep.subr.msk.bf16.mxu1 %vm2052_vm1, %v1480_v5  ;;  %1517 = vset.pattern.permute.xlu0 %v1719_v59  ;;  %v872_v10 = vmul.f32 %v1697_v0, %v789_v23 }
 0x1da   : > { %v787_v27 = vpop.permute.xlu1 %786  ;;  %1485 = vmatpush3.bf16.xpose.msk.msra.mxu1 %vm2052_vm1, %v1483_v38 }
 0x1db   : > { %v871_v28 = vmul.f32 %v1687_v9, %v787_v27 }
 0x1dc   : > { %v817_v30 = vpop.permute.xlu0 %816 }
 0x1dd   : > { %v1489_v44 = vpack.c.bf16 %v871_v28, %v870_v58  ;;  %v886_v33 = vmul.f32 %v1693_v26, %v817_v30 }
 0x1de   : > { %v823_v59 = vpop.permute.xlu1 %822 }
 0x1df   : > { %v1486_v21 = vpack.c.bf16 %v887_v15, %v886_v33  ;;  %v889_v42 = vmul.f32 %v1699_v32, %v823_v59 }
 0x1e0   : > { %v793_v34 = vpop.permute.xlu0 %792 }
 0x1e1   : > { %1488 = vmatprep.subr.msk.bf16.mxu1 %vm2052_vm1, %v1486_v21  ;;  %v874_v50 = vmul.f32 %v1709_v47, %v793_v34 }
 0x1e2   : > { %v791_v36 = vpop.permute.xlu1 %790  ;;  %1491 = vmatpush3.bf16.xpose.msk.msra.mxu1 %vm2052_vm1, %v1489_v44 }
 0x1e3   : > { %v873_v40 = vmul.f32 %v1695_v35, %v791_v36 }
 0x1e4   : > { %v821_v41 = vpop.permute.xlu0 %820 }
 0x1e5   : > { %v1495_v29 = vpack.c.bf16 %v873_v40, %v872_v10  ;;  %v888_v45 = vmul.f32 %v1701_v37, %v821_v41 }
 0x1e6   : > { %v827_v7 = vpop.permute.xlu1 %826 }
 0x1e7   : > { %v1492_v46 = vpack.c.bf16 %v889_v42, %v888_v45  ;;  %v891_v52 = vmul.f32 %v1703_v31, %v827_v7 }
 0x1e8   : > { %v825_v63 = vpop.permute.xlu0 %824 }
 0x1e9   : > { %v890_v53 = vmul.f32 %v1705_v48, %v825_v63  ;;  %1494 = vmatprep.subr.msk.bf16.mxu1 %vm2052_vm1, %v1492_v46 }
 0x1ea   : > { %v795_v57 = vpop.permute.xlu1 %794  ;;  %1497 = vmatpush3.bf16.xpose.msk.msra.mxu1 %vm2052_vm1, %v1495_v29 }
 0x1eb   : > { %v1498_v56 = vpack.c.bf16 %v891_v52, %v890_v53  ;;  %v875_v61 = vmul.f32 %v1707_v51, %v795_v57 }
 0x1ed   : > { %v1501_v60 = vpack.c.bf16 %v875_v61, %v874_v50  ;;  %1500 = vmatprep.subr.msk.bf16.mxu1 %vm2052_vm1, %v1498_v56 }
 0x1f2   : > { %1503 = vmatpush3.bf16.xpose.msk.msra.mxu1 %vm2052_vm1, %v1501_v60 }
 0x1fb   : > { %v904_v16 = vpop.permute.xlu1 %903 }
 0x1fc   : > { %v909_v11 = vrot.slane %v904_v16, %v908_v4 }
 0x214   : > { %v926_v1 = vpop.trf.xlu0 }
 0x215   : > { %1342 = vmatprep.mubr.msk.f32.mxu1 %vm942_vm0, %v926_v1 }
 0x216   : > { %1343 = vmatmul.mubr.msk.f32.vlgmr.msra.gmra.mrb[0].mxu1 %vm942_vm0, %v926_v1 }
 0x2e9   : > { %v1108_v39 = vpop.f32.mrb[0].mxu1 }
 0x2ea   : > { %v1109_v62 = vadd.f32 %v1108_v39, %v909_v11  ;;  %v1110_v19 = vpop.f32.mrb[1].mxu1 }
 0x2eb   : > { %v1111_v12 = vadd.f32 %v1110_v19, %v909_v11 }
 0x2ed   : > { %v1115_v14 = vcombine.low %v1109_v62, %v1111_v12 }
 0x2ef   : > { %v1122_v17 = vrot.slane %v1115_v14, %v1121_v43 }
 0x2f1   : > { %v1129_v20 = vrot.slane %v1122_v17, %v1121_v43 }
 0x2f3   : > { %1135 = vst.msk [vmem:[%s226_s7] sm:$0x3] %vm1133_vm2, %v1129_v20 }
 0x2f4 PF: > { %s17_s20 = sadd.s32 1, %s1716_s20  }
 0x2f5   : > { %p14_p5 = scmp.ge.s32.totalorder %s17_s20, 4  }
 0x2f7   :  { %16 = sbr.rel (!%p14_p5) target bundleno = 3 (0x3), region = 70 }

</bundles_post_ra>
